<compile_context>
chip_gen: v7x
topology: tpu7x:2x2x1
jax: 0.10.0
libtpu: 0.0.40
codegen_flags: <defaults>
</compile_context>

<pallas_src>
import functools

import jax
import jax.numpy as jnp
from jax.experimental import pallas as pl
from jax.experimental.pallas import tpu as pltpu

NEG = -1e9                      # additive mask bias (mask==1 means padding, DrQA convention)
MXU_DTYPE = jnp.bfloat16        # matmul operand / inter-kernel activation dtype
_VMEM_LIMIT = 32 * 1024 * 1024  # explicit scoped-VMEM limit (valid on v5e/v6e/v7x)


def _round_up(x, m):
    return ((x + m - 1) // m) * m


def _full_spec(shape):
    n = len(shape)
    return pl.BlockSpec(shape, lambda i, _n=n: (0,) * _n)


def _softmax(x, axis=-1, approx=True):
    # NEG is finite: a fully masked row degenerates to uniform, never NaN.
    m = jnp.max(x, axis=axis, keepdims=True)
    e = jnp.exp(x - m)
    s = jnp.sum(e, axis=axis, keepdims=True)
    if approx:
        return e * pl.reciprocal(s, approx=True)   # EUP slot (internal softmaxes only)
    return e / s


def _pad_batch(x, bp, fill=0):
    pad = bp - x.shape[0]
    if pad <= 0:
        return x
    cfg = ((0, pad),) + ((0, 0),) * (x.ndim - 1)
    return jnp.pad(x, cfg, constant_values=fill)


# ----------------------------------------------------------------------------
# Row-tiled dense / gated-encoding kernels
# ----------------------------------------------------------------------------
def _dense_kernel(x_ref, w_ref, b_ref, o_ref):
    o_ref[...] = (jnp.dot(x_ref[...], w_ref[...],
                          preferred_element_type=jnp.float32)
                  + b_ref[...]).astype(o_ref.dtype)


def _gated_kernel(d_ref, qa_ref, w_ref, b_ref, o_ref):
    # fused concat: [doc_hiddens | q_aware] built in VMEM, never round-tripped to HBM
    x = jnp.concatenate([d_ref[...], qa_ref[...]], axis=-1)           # (bm, 2D) bf16
    g = jax.nn.sigmoid(jnp.dot(x, w_ref[...],
                               preferred_element_type=jnp.float32) + b_ref[...])
    o_ref[...] = (x.astype(jnp.float32) * g).astype(o_ref.dtype)


def _row_tiled_call(kernel, row_inputs, const_inputs, n_out, out_dtype):
    """Tiles `kernel` over rows of the 2D `row_inputs`; `const_inputs` passed whole."""
    M = row_inputs[0].shape[0]
    # >=2 row blocks when possible (v7x megacore), capped at 256 rows/block.
    bm = max(8, min(256, _round_up(-(-M // 2), 8)))
    Mp = _round_up(M, bm)
    if Mp != M:
        row_inputs = [jnp.pad(x, ((0, Mp - M), (0, 0))) for x in row_inputs]
    in_specs = ([pl.BlockSpec((bm, x.shape[1]), lambda i: (i, 0)) for x in row_inputs]
                + [_full_spec(c.shape) for c in const_inputs])
    out = pl.pallas_call(
        kernel,
        out_shape=jax.ShapeDtypeStruct((Mp, n_out), out_dtype),
        grid=(Mp // bm,),
        in_specs=in_specs,
        out_specs=pl.BlockSpec((bm, n_out), lambda i: (i, 0)),
        compiler_params=pltpu.CompilerParams(
            dimension_semantics=("parallel",),
            vmem_limit_bytes=_VMEM_LIMIT),
    )(*row_inputs, *const_inputs)
    return out[:M]


def dense(x2d, w, b, out_dtype=jnp.float32):
    return _row_tiled_call(_dense_kernel, [x2d.astype(MXU_DTYPE)], [w, b],
                           w.shape[1], out_dtype)


def gated_encoding(doc, qa, w, b):
    B, T, D = doc.shape
    out = _row_tiled_call(_gated_kernel,
                          [doc.reshape(B * T, D), qa.reshape(B * T, D)],
                          [w, b], 2 * D, MXU_DTYPE)
    return out.reshape(B, T, 2 * D)


# ----------------------------------------------------------------------------
# Fused BiLSTM layer: grid=(2,) over directions, recurrence collapsed in-kernel.
# ----------------------------------------------------------------------------
def _bilstm_kernel(x_ref, wih_ref, whh_ref, b_ref, o_ref, gx_ref):
    d = pl.program_id(0)                   # 0 = forward, 1 = backward direction
    T, B, G4 = gx_ref.shape
    H = whh_ref.shape[1]

    # Hoisted input projection for ALL timesteps of this direction: one MXU matmul
    # (T*B, Din) x (Din, 4H) into a VMEM scratch slab (no per-step tiny matmuls,
    # no gx HBM round trip).  (T*B,4H)->(T,B,4H) is a layout no-op (B == 8 sublanes, f32).
    gx = (jnp.dot(x_ref[...], wih_ref[0], preferred_element_type=jnp.float32)
          + b_ref[0])
    gx_ref[...] = gx.reshape(T, B, G4)

    whh = whh_ref[0]                       # (H, 4H) bf16, resident across the loop

    def step(s, carry):
        h, c = carry                       # f32 (B, H) loop carries (live in vregs)
        t = jnp.where(d == 0, s, T - 1 - s)
        g = gx_ref[t] + jnp.dot(h.astype(MXU_DTYPE), whh,
                                preferred_element_type=jnp.float32)   # (B, 4H)
        # Full-width EUP sigmoid/tanh over the whole (B, 4H) vreg, then static gate
        # slices (PyTorch order i, f, g, o).  NOTE: pad H to 128 at production so the
        # gate updates run on whole vregs.
        sig = jax.nn.sigmoid(g)
        th = jnp.tanh(g)
        i_g = sig[:, 0 * H:1 * H]
        f_g = sig[:, 1 * H:2 * H]
        g_g = th[:, 2 * H:3 * H]
        o_g = sig[:, 3 * H:4 * H]
        c = f_g * c + i_g * g_g
        h = o_g * jnp.tanh(c)
        o_ref[0, t] = h                    # f32 (B, H): sublane-aligned dynamic store
        return h, c

    init = (jnp.zeros((B, H), jnp.float32), jnp.zeros((B, H), jnp.float32))
    jax.lax.fori_loop(0, T, step, init)


def bilstm_layer(x_btd, p):
    """One BiLSTM layer.  p: wih (2, Din, 4H) bf16, whh (2, H, 4H) bf16, b (2, 1, 4H) f32."""
    B, T, Din = x_btd.shape
    H = p["whh"].shape[1]
    # Time-major 2D view of the layer INPUT (one small XLA transpose, ~4x cheaper than
    # the old gx-sized transpose); rows ordered (t, b) so gx reshapes for free in-kernel.
    x2d = jnp.transpose(x_btd.astype(MXU_DTYPE), (1, 0, 2)).reshape(T * B, Din)

    out = pl.pallas_call(
        _bilstm_kernel,
        out_shape=jax.ShapeDtypeStruct((2, T, B, H), jnp.float32),
        grid=(2,),
        in_specs=[pl.BlockSpec((T * B, Din), lambda d: (0, 0)),
                  pl.BlockSpec((1, Din, 4 * H), lambda d: (d, 0, 0)),
                  pl.BlockSpec((1, H, 4 * H), lambda d: (d, 0, 0)),
                  pl.BlockSpec((1, 1, 4 * H), lambda d: (d, 0, 0))],
        out_specs=pl.BlockSpec((1, T, B, H), lambda d: (d, 0, 0, 0)),
        scratch_shapes=[pltpu.VMEM((T, B, 4 * H), jnp.float32)],   # gx slab (chunk T at prod)
        compiler_params=pltpu.CompilerParams(
            dimension_semantics=("parallel",),      # direction -> one TC each on v7x
            vmem_limit_bytes=_VMEM_LIMIT),
    )(x2d, p["wih"], p["whh"], p["b"])

    # (2, T, B, H) -> (B, T, 2H) with [fwd | bwd] features (single output-sized transpose).
    return jnp.transpose(out, (2, 1, 0, 3)).reshape(B, T, 2 * H).astype(MXU_DTYPE)


def stacked_brnn(x_btd, layer_params, concat_layers=False):
    outs = []
    h = x_btd
    for p in layer_params:
        h = bilstm_layer(h, p)
        outs.append(h)
    return jnp.concatenate(outs, axis=-1) if concat_layers else outs[-1]


# ----------------------------------------------------------------------------
# SeqAttnMat (identity) + sequential_weighted_avg + max_attentional_aggregation,
# tiled over the doc axis with a running column-max scratch.
# ----------------------------------------------------------------------------
def _cart_kernel(d_ref, q_ref, qb_ref, rb_ref, qa_ref, qma_ref, kmax_ref):
    i = pl.program_id(0)

    @pl.when(i == 0)
    def _():
        kmax_ref[...] = jnp.full(kmax_ref.shape, -jnp.inf, jnp.float32)

    D = d_ref[...]                                    # (B, DT, H2) bf16 doc tile
    Q = q_ref[...]                                    # (B, Tq, H2) bf16 (resident)
    qb = qb_ref[...]                                  # (B, Tq) question mask bias
    scores = jnp.einsum("bik,bjk->bij", D, Q,
                        preferred_element_type=jnp.float32)           # (B, DT, Tq)

    # running column-max over doc rows for max_attentional_aggregation; structural-pad
    # rows excluded via rb, x1-mask rows kept (reference does not mask the doc axis).
    kmax_ref[...] = jnp.maximum(kmax_ref[...],
                                jnp.max(scores + rb_ref[...], axis=1))

    alpha = _softmax(scores + qb[:, None, :], axis=-1)
    qa_ref[...] = jnp.einsum("bij,bjk->bik", alpha.astype(Q.dtype), Q,
                             preferred_element_type=jnp.float32).astype(qa_ref.dtype)

    @pl.when(i == pl.num_programs(0) - 1)
    def _():
        beta = _softmax(kmax_ref[...] + qb, axis=-1)                  # (B, Tq)
        qma_ref[...] = jnp.sum(beta[:, :, None] * Q.astype(jnp.float32), axis=1)


def cartesian_attn(doc_p, ques, q_bias, row_bias, doc_tile):
    B, Tdp, H2 = doc_p.shape
    Tq = ques.shape[1]
    return pl.pallas_call(
        _cart_kernel,
        out_shape=(jax.ShapeDtypeStruct((B, Tdp, H2), MXU_DTYPE),
                   jax.ShapeDtypeStruct((B, H2), jnp.float32)),
        grid=(Tdp // doc_tile,),
        in_specs=[pl.BlockSpec((B, doc_tile, H2), lambda i: (0, i, 0)),
                  _full_spec(ques.shape),
                  _full_spec(q_bias.shape),
                  pl.BlockSpec((1, doc_tile, 1), lambda i: (0, i, 0))],
        out_specs=(pl.BlockSpec((B, doc_tile, H2), lambda i: (0, i, 0)),
                   _full_spec((B, H2))),
        scratch_shapes=[pltpu.VMEM((B, Tq), jnp.float32)],
        compiler_params=pltpu.CompilerParams(
            dimension_semantics=("arbitrary",),      # running-max carry across tiles
            vmem_limit_bytes=_VMEM_LIMIT),
    )(doc_p, ques, q_bias, row_bias)


# ----------------------------------------------------------------------------
# GatedMultifactorSelfAttnEnc: query rows tiled over the doc axis, keys resident.
# ----------------------------------------------------------------------------
def _mfa_kernel(num_factor, pq_ref, pk_ref, wf_ref, wg_ref, bg_ref, kb_ref, o_ref):
    Pq = pq_ref[...]                                  # (B, DT, D) bf16 query tile
    Pk = pk_ref[...]                                  # (B, Tk, D) bf16 keys (resident)
    B, DT, D = Pq.shape
    kb = kb_ref[...]                                  # (B, Tk) key mask bias
    Pq32 = Pq.astype(jnp.float32)                     # 32-bit copy so in-kernel reshapes
                                                      # avoid packed-dtype relayouts
    # single fused projection matmul for ALL factors
    pw = jnp.dot(Pq32.reshape(B * DT, D).astype(MXU_DTYPE), wf_ref[...],
                 preferred_element_type=jnp.float32).reshape(B, DT, num_factor * D)

    # TODO(synk): the F score matmuls could also be fused by folding f into the row dim;
    # kept as a static F-step loop of back-to-back MXU pushes against the resident Pk to
    # avoid an in-kernel lane->sublane relayout of pw.
    m = None
    for f in range(num_factor):
        pf = pw[:, :, f * D:(f + 1) * D].astype(MXU_DTYPE)
        s_f = jnp.einsum("btd,bsd->bts", pf, Pk,
                         preferred_element_type=jnp.float32)          # (B, DT, Tk)
        m = s_f if m is None else jnp.maximum(m, s_f)

    alpha = _softmax(m + kb[:, None, :], axis=-1)
    satt = jnp.einsum("bts,bsd->btd", alpha.astype(MXU_DTYPE), Pk,
                      preferred_element_type=jnp.float32)             # (B, DT, D) f32
    cat = jnp.concatenate([Pq32, satt], axis=-1)                      # (B, DT, 2D)
    gate = jax.nn.sigmoid(
        jnp.dot(cat.reshape(B * DT, 2 * D).astype(MXU_DTYPE), wg_ref[...],
                preferred_element_type=jnp.float32)
        + bg_ref[...]).reshape(B, DT, 2 * D)
    o_ref[...] = (cat * gate).astype(o_ref.dtype)


def multifactor_attn(qdep_p, key_bias, wf, wg, bg, num_factor, doc_tile):
    B, Tdp, D = qdep_p.shape
    return pl.pallas_call(
        functools.partial(_mfa_kernel, num_factor),
        out_shape=jax.ShapeDtypeStruct((B, Tdp, 2 * D), MXU_DTYPE),
        grid=(Tdp // doc_tile,),
        in_specs=[pl.BlockSpec((B, doc_tile, D), lambda i: (0, i, 0)),
                  _full_spec((B, Tdp, D)),
                  _full_spec(wf.shape),
                  _full_spec(wg.shape),
                  _full_spec(bg.shape),
                  _full_spec(key_bias.shape)],
        out_specs=pl.BlockSpec((B, doc_tile, 2 * D), lambda i: (0, i, 0)),
        compiler_params=pltpu.CompilerParams(
            dimension_semantics=("parallel",),
            vmem_limit_bytes=_VMEM_LIMIT),
    )(qdep_p, qdep_p, wf, wg, bg, key_bias)


# ----------------------------------------------------------------------------
# GetOrthogonal(identity) + nil_linear(+)/(-) + add + max over the sequence axis.
# lin(plus) + lin(minus) == X @ Wn + 2*bn (nil_linear affine; plus + minus == X).
# Tiled over the doc axis with a running max accumulated in the resident output block.
# ----------------------------------------------------------------------------
def _nil_kernel(x_ref, wn_ref, bn_ref, rb_ref, o_ref):
    i = pl.program_id(0)

    @pl.when(i == 0)
    def _():
        o_ref[...] = jnp.full(o_ref.shape, -jnp.inf, o_ref.dtype)

    B, DT, D2 = x_ref.shape
    x2d = x_ref[...].astype(jnp.float32).reshape(B * DT, D2).astype(MXU_DTYPE)
    lin = (jnp.dot(x2d, wn_ref[...], preferred_element_type=jnp.float32)
           + 2.0 * bn_ref[...])
    lin = lin.reshape(B, DT, -1) + rb_ref[...]        # structural-pad rows get NEG
    o_ref[...] = jnp.maximum(o_ref[...], jnp.max(lin, axis=1))


def ortho_nil(mfa_p, row_bias, wn, bn, doc_tile):
    B, Tdp, D2 = mfa_p.shape
    Dh = wn.shape[1]
    return pl.pallas_call(
        _nil_kernel,
        out_shape=jax.ShapeDtypeStruct((B, Dh), jnp.float32),
        grid=(Tdp // doc_tile,),
        in_specs=[pl.BlockSpec((B, doc_tile, D2), lambda i: (0, i, 0)),
                  _full_spec(wn.shape),
                  _full_spec(bn.shape),
                  pl.BlockSpec((1, doc_tile, 1), lambda i: (0, i, 0))],
        out_specs=_full_spec((B, Dh)),
        compiler_params=pltpu.CompilerParams(
            dimension_semantics=("arbitrary",),
            vmem_limit_bytes=_VMEM_LIMIT),
    )(mfa_p, wn, bn, row_bias)


# ----------------------------------------------------------------------------
# BilinearSeqAttnwithNIL (eval, normalize=True): start & end heads fused, Wy computed
# once, NIL vector concatenated in VMEM (no HBM concat of [nil, hiddens]).
# ----------------------------------------------------------------------------
def _bilinear_kernel(xs_ref, xe_ref, nil_ref, y_ref, w_ref, b_ref, mb_ref, os_ref, oe_ref):
    Wy = (jnp.dot(y_ref[...].astype(MXU_DTYPE), w_ref[...],
                  preferred_element_type=jnp.float32) + b_ref[...])      # (B, Dx)
    mb = mb_ref[...]                                                     # (B, 1 + Td)
    nil_s = jnp.sum(nil_ref[...] * Wy, axis=-1, keepdims=True)           # (B, 1)

    def head(X):
        s = jnp.sum(X.astype(jnp.float32) * Wy[:, None, :], axis=-1)     # (B, Td)
        full = jnp.concatenate([nil_s, s], axis=1) + mb                  # (B, 1 + Td)
        return _softmax(full, axis=-1, approx=False)   # exact divide for final probs

    os_ref[...] = head(xs_ref[...])
    oe_ref[...] = head(xe_ref[...])


def bilinear_nil_attn_pair(xs, xe, nil, y, w, b, mask_bias):
    B, Td, Dx = xs.shape
    L = mask_bias.shape[1]
    # TODO(synk): tile over L with a two-pass / online softmax at production doc lengths.
    return pl.pallas_call(
        _bilinear_kernel,
        out_shape=(jax.ShapeDtypeStruct((B, L), jnp.float32),
                   jax.ShapeDtypeStruct((B, L), jnp.float32)),
        grid=(1,),
        in_specs=[_full_spec(xs.shape), _full_spec(xe.shape), _full_spec(nil.shape),
                  _full_spec(y.shape), _full_spec(w.shape), _full_spec(b.shape),
                  _full_spec(mask_bias.shape)],
        out_specs=(_full_spec((B, L)), _full_spec((B, L))),
        compiler_params=pltpu.CompilerParams(
            dimension_semantics=("arbitrary",),
            vmem_limit_bytes=_VMEM_LIMIT),
    )(xs, xe, nil, y, w, b, mask_bias)


# ----------------------------------------------------------------------------
# Parameter init (deterministic, synthetic); matmul weights stored in bf16
# ----------------------------------------------------------------------------
def init_params(key, vocab, emb_dim, hidden, doc_layers, num_factor):
    DH = 2 * hidden                                   # doc/question hidden size
    keys = iter(jax.random.split(key, 64))

    def w(shape, scale=0.1):
        return (scale * jax.random.normal(next(keys), shape)).astype(MXU_DTYPE)

    def lstm(din):
        # per-direction params stacked on axis 0, PyTorch gate column order (i, f, g, o)
        return dict(
            wih=jnp.stack([w((din, 4 * hidden)), w((din, 4 * hidden))], axis=0),
            whh=jnp.stack([w((hidden, 4 * hidden)), w((hidden, 4 * hidden))], axis=0),
            b=jnp.zeros((2, 1, 4 * hidden), jnp.float32))     # b_ih + b_hh

    def stacked(din, nlayers):
        return [lstm(din if i == 0 else DH) for i in range(nlayers)]

    emb = 0.1 * jax.random.normal(next(keys), (vocab, emb_dim))
    emb = emb.at[0].set(0.0)                          # padding_idx=0

    return dict(
        embedding=emb.astype(jnp.float32),
        seqlevelenc=stacked(emb_dim, doc_layers),
        gate_w=w((2 * DH, 2 * DH)), gate_b=jnp.zeros((1, 2 * DH), jnp.float32),
        qdep_penc=stacked(2 * DH, doc_layers),
        mfa_wf=w((DH, num_factor * DH)),
        mfa_wg=w((2 * DH, 2 * DH)), mfa_bg=jnp.zeros((1, 2 * DH), jnp.float32),
        nil_w=w((2 * DH, DH)), nil_b=jnp.zeros((1, DH), jnp.float32),
        ans_start=stacked(2 * DH, 1),
        ans_end=stacked(DH, 1),
        qtilde_w=w((3 * DH, DH)), qtilde_b=jnp.zeros((1, DH), jnp.float32),
        bilin_w=w((DH, DH)), bilin_b=jnp.zeros((1, DH), jnp.float32),
        num_factor=num_factor,
    )


# ----------------------------------------------------------------------------
# Forward pass (mirrors RnnDocReader.forward, eval mode)
# ----------------------------------------------------------------------------
def rnn_doc_reader_forward(params, x1, x1_f, x1_char, x1_mask, x2, x2_char, x2_mask):
    del x1_char, x2_char, x1_f  # char path disabled; x1_f only used by get_qwh2 (TODO)

    B = x1.shape[0]
    Bp = _round_up(B, 8)        # pad batch -> full f32 sublanes / free in-kernel reshapes
    x1 = _pad_batch(x1, Bp)
    x2 = _pad_batch(x2, Bp)
    x1_mask = _pad_batch(x1_mask, Bp, fill=1)          # padded rows = all padding
    x2_mask = _pad_batch(x2_mask, Bp, fill=1)

    emb = params["embedding"]
    x1_emb = jnp.take(emb, x1, axis=0).astype(MXU_DTYPE)   # (Bp, Ld, E) gather (XLA glue)
    x2_emb = jnp.take(emb, x2, axis=0).astype(MXU_DTYPE)   # (Bp, Lq, E)

    drnn_input = x1_emb[:, 1:, :]                     # narrow(1, 1, Ld-1)
    orig_x1_mask = x1_mask[:, 1:]
    Td = drnn_input.shape[1]
    DT = 8 if Td <= 64 else 128                       # doc-axis tile for attention kernels
    Tdp = _round_up(Td, DT)

    doc_hiddens = stacked_brnn(drnn_input, params["seqlevelenc"])       # (Bp, Td, DH) bf16
    question_hiddens = stacked_brnn(x2_emb, params["seqlevelenc"])      # (Bp, Lq, DH) bf16

    q_bias = x2_mask.astype(jnp.float32) * NEG                          # (Bp, Lq)
    # structural doc-pad bias (Td -> Tdp) and key bias (x1 padding + structural pad)
    row_bias = jnp.where(jnp.arange(Tdp) >= Td, NEG, 0.0).astype(
        jnp.float32)[None, :, None]                                     # (1, Tdp, 1)
    key_bias = jnp.concatenate(
        [orig_x1_mask.astype(jnp.float32) * NEG,
         jnp.full((Bp, Tdp - Td), NEG, jnp.float32)], axis=1)           # (Bp, Tdp)

    doc_p = jnp.pad(doc_hiddens, ((0, 0), (0, Tdp - Td), (0, 0)))
    q_aware_p, q_ma = cartesian_attn(doc_p, question_hiddens, q_bias, row_bias, DT)
    q_aware = q_aware_p[:, :Td]                                         # (Bp, Td, DH) bf16

    gated = gated_encoding(doc_hiddens, q_aware,
                           params["gate_w"], params["gate_b"])          # (Bp, Td, 2DH) bf16
    qdep_hiddens = stacked_brnn(gated, params["qdep_penc"])             # (Bp, Td, DH) bf16

    qdep_p = jnp.pad(qdep_hiddens, ((0, 0), (0, Tdp - Td), (0, 0)))
    mfa_p = multifactor_attn(qdep_p, key_bias, params["mfa_wf"],
                             params["mfa_wg"], params["mfa_bg"],
                             params["num_factor"], DT)                  # (Bp, Tdp, 2DH) bf16
    mfa = mfa_p[:, :Td]

    nil = ortho_nil(mfa_p, row_bias, params["nil_w"], params["nil_b"], DT)   # (Bp, DH) f32

    ans_start_h = stacked_brnn(mfa, params["ans_start"])                # (Bp, Td, DH) bf16
    ans_end_h = stacked_brnn(ans_start_h, params["ans_end"])            # (Bp, Td, DH) bf16

    q_f = jnp.concatenate([question_hiddens[:, 0, :],
                           question_hiddens[:, 1, :]], axis=-1)         # (Bp, 2DH)
    q_tilde = dense(jnp.concatenate([q_ma.astype(MXU_DTYPE), q_f], axis=-1),
                    params["qtilde_w"], params["qtilde_b"],
                    out_dtype=jnp.float32)                              # (Bp, DH)

    full_bias = x1_mask.astype(jnp.float32) * NEG                       # (Bp, Ld = 1 + Td)
    start_scores, end_scores = bilinear_nil_attn_pair(
        ans_start_h, ans_end_h, nil, q_tilde,
        params["bilin_w"], params["bilin_b"], full_bias)
    return start_scores[:B], end_scores[:B]


if __name__ == "__main__":
    key = jax.random.PRNGKey(0)
    B, LD, LQ = 2, 16, 8
    VOCAB, E, H = 50, 32, 32
    DOC_LAYERS, NUM_FACTOR = 1, 2

    kp, k1, k2, k3 = jax.random.split(key, 4)
    params = init_params(kp, VOCAB, E, H, DOC_LAYERS, NUM_FACTOR)

    # masks: 1 = padding (DrQA convention)
    x1_mask = (jnp.arange(LD)[None, :] >= jnp.array([[16], [13]])).astype(jnp.int32)
    x2_mask = (jnp.arange(LQ)[None, :] >= jnp.array([[8], [6]])).astype(jnp.int32)

    x1 = jax.random.randint(k1, (B, LD), 1, VOCAB) * (1 - x1_mask)
    x2 = jax.random.randint(k2, (B, LQ), 1, VOCAB) * (1 - x2_mask)
    x1_f = jax.random.randint(k3, (B, LD, 2), 0, 4)   # doc feature indices (unused, as in ref forward)
    x1_char = None
    x2_char = None

    start_scores, end_scores = rnn_doc_reader_forward(
        params, x1, x1_f, x1_char, x1_mask, x2, x2_char, x2_mask)
    jax.block_until_ready((start_scores, end_scores))

    assert start_scores.shape == (B, LD) and end_scores.shape == (B, LD)
    assert bool(jnp.all(jnp.isfinite(start_scores)))
    assert bool(jnp.all(jnp.isfinite(end_scores)))
    # scores are softmax-normalized over the (NIL + doc) axis
    assert bool(jnp.allclose(jnp.sum(start_scores, axis=-1), 1.0, atol=1e-4))
    assert bool(jnp.allclose(jnp.sum(end_scores, axis=-1), 1.0, atol=1e-4))
    print("KERNEL_OK")
</pallas_src>

<mosaic_0001>
module attributes {stable_mosaic.version = 11 : i64} {
  func.func @_bilstm_kernel(%arg0: i32, %arg1: memref<120x32xbf16, #tpu.memory_space<vmem>>, %arg2: memref<1x32x128xbf16, #tpu.memory_space<vmem>>, %arg3: memref<1x32x128xbf16, #tpu.memory_space<vmem>>, %arg4: memref<1x1x128xf32, #tpu.memory_space<vmem>>, %arg5: memref<1x15x8x32xf32, #tpu.memory_space<vmem>>, %arg6: memref<15x8x128xf32, #tpu.memory_space<vmem>>) attributes {dimension_semantics = [#tpu.dimension_semantics<parallel>], iteration_bounds = array<i64: 2>, scalar_prefetch = 0 : i64, scratch_operands = 1 : i64, tpu.core_type = #tpu.core_type<tc>, window_params = [{pipeline_mode = #tpu.pipeline_mode<synchronous>, transform_indices = @transform_0, window_bounds = array<i64: 120, 32>}, {transform_indices = @transform_1, window_bounds = array<i64: 1, 32, 128>}, {transform_indices = @transform_2, window_bounds = array<i64: 1, 32, 128>}, {transform_indices = @transform_3, window_bounds = array<i64: 1, 1, 128>}, {transform_indices = @transform_4, window_bounds = array<i64: 1, 15, 8, 32>}]} {
    %c0 = arith.constant 0 : index
    %c0_0 = arith.constant 0 : index
    %0 = vector.load %arg1[%c0, %c0_0] : memref<120x32xbf16, #tpu.memory_space<vmem>>, vector<120x32xbf16>
    %c0_1 = arith.constant 0 : index
    %c0_2 = arith.constant 0 : index
    %c0_3 = arith.constant 0 : index
    %1 = vector.load %arg2[%c0_1, %c0_2, %c0_3] : memref<1x32x128xbf16, #tpu.memory_space<vmem>>, vector<1x32x128xbf16>
    %2 = vector.shape_cast %1 : vector<1x32x128xbf16> to vector<32x128xbf16>
    %cst = arith.constant dense<0.000000e+00> : vector<120x128xf32>
    %3 = tpu.matmul %0, %2, %cst {dimension_numbers = #tpu.dot_dimension_numbers<[1], [0], [0], [1], [0, 0, 1, 1], [], []>} : vector<120x32xbf16>, vector<32x128xbf16>, vector<120x128xf32> -> vector<120x128xf32>
    %c0_4 = arith.constant 0 : index
    %c0_5 = arith.constant 0 : index
    %c0_6 = arith.constant 0 : index
    %4 = vector.load %arg4[%c0_4, %c0_5, %c0_6] : memref<1x1x128xf32, #tpu.memory_space<vmem>>, vector<1x1x128xf32>
    %5 = vector.shape_cast %4 : vector<1x1x128xf32> to vector<1x128xf32>
    %6 = vector.broadcast %5 : vector<1x128xf32> to vector<120x128xf32>
    %7 = arith.addf %3, %6 : vector<120x128xf32>
    %8 = vector.shape_cast %7 : vector<120x128xf32> to vector<15x8x128xf32>
    %c0_7 = arith.constant 0 : index
    %c0_8 = arith.constant 0 : index
    %c0_9 = arith.constant 0 : index
    %9 = vector.load %arg6[%c0_7, %c0_8, %c0_9] : memref<15x8x128xf32, #tpu.memory_space<vmem>>, vector<15x8x128xf32>
    tpu.vector_store %arg6[%c0_7, %c0_8, %c0_9], %8 {strides = array<i32>} : memref<15x8x128xf32, #tpu.memory_space<vmem>>, vector<15x8x128xf32>,
    %c0_10 = arith.constant 0 : index
    %c0_11 = arith.constant 0 : index
    %c0_12 = arith.constant 0 : index
    %10 = vector.load %arg3[%c0_10, %c0_11, %c0_12] : memref<1x32x128xbf16, #tpu.memory_space<vmem>>, vector<1x32x128xbf16>
    %11 = vector.shape_cast %10 : vector<1x32x128xbf16> to vector<32x128xbf16>
    %cst_13 = arith.constant 0.000000e+00 : f32
    %12 = vector.broadcast %cst_13 : f32 to vector<8x32xf32>
    %cst_14 = arith.constant 0.000000e+00 : f32
    %13 = vector.broadcast %cst_14 : f32 to vector<8x32xf32>
    %c0_i32 = arith.constant 0 : i32
    %c15_i32 = arith.constant 15 : i32
    %14 = arith.addi %c0_i32, %c15_i32 : i32
    %c1_i32 = arith.constant 1 : i32
    %15:2 = scf.for %arg7 = %c0_i32 to %14 step %c1_i32 iter_args(%arg8 = %12, %arg9 = %13) -> (vector<8x32xf32>, vector<8x32xf32>)  : i32 {
      %c0_i32_16 = arith.constant 0 : i32
      %16 = arith.cmpi eq, %arg0, %c0_i32_16 : i32
      %c14_i32 = arith.constant 14 : i32
      %17 = arith.subi %c14_i32, %arg7 : i32
      %18 = arith.select %16, %arg7, %17 : i32
      %19 = arith.index_cast %18 : i32 to index
      %c0_17 = arith.constant 0 : index
      %c0_18 = arith.constant 0 : index
      %20 = vector.load %arg6[%19, %c0_17, %c0_18] : memref<15x8x128xf32, #tpu.memory_space<vmem>>, vector<1x8x128xf32>
      %21 = vector.shape_cast %20 : vector<1x8x128xf32> to vector<8x128xf32>
      %22 = arith.truncf %arg8 : vector<8x32xf32> to vector<8x32xbf16>
      %cst_19 = arith.constant dense<0.000000e+00> : vector<8x128xf32>
      %23 = tpu.matmul %22, %11, %cst_19 {dimension_numbers = #tpu.dot_dimension_numbers<[1], [0], [0], [1], [0, 0, 1, 1], [], []>} : vector<8x32xbf16>, vector<32x128xbf16>, vector<8x128xf32> -> vector<8x128xf32>
      %24 = arith.addf %21, %23 : vector<8x128xf32>
      %25 = arith.negf %24 : vector<8x128xf32>
      %26 = math.exp %25 : vector<8x128xf32>
      %cst_20 = arith.constant 1.000000e+00 : f32
      %27 = vector.broadcast %cst_20 : f32 to vector<8x128xf32>
      %28 = arith.addf %27, %26 : vector<8x128xf32>
      %29 = arith.divf %27, %28 : vector<8x128xf32>
      %30 = math.tanh %24 : vector<8x128xf32>
      %31 = vector.extract_strided_slice %29 {offsets = [0, 0], sizes = [8, 32], strides = [1, 1]} : vector<8x128xf32> to vector<8x32xf32>
      %32 = vector.extract_strided_slice %29 {offsets = [0, 32], sizes = [8, 32], strides = [1, 1]} : vector<8x128xf32> to vector<8x32xf32>
      %33 = vector.extract_strided_slice %30 {offsets = [0, 64], sizes = [8, 32], strides = [1, 1]} : vector<8x128xf32> to vector<8x32xf32>
      %34 = vector.extract_strided_slice %29 {offsets = [0, 96], sizes = [8, 32], strides = [1, 1]} : vector<8x128xf32> to vector<8x32xf32>
      %35 = arith.mulf %32, %arg9 : vector<8x32xf32>
      %36 = arith.mulf %31, %33 : vector<8x32xf32>
      %37 = arith.addf %35, %36 : vector<8x32xf32>
      %38 = math.tanh %37 : vector<8x32xf32>
      %39 = arith.mulf %34, %38 : vector<8x32xf32>
      %c0_21 = arith.constant 0 : index
      %40 = arith.index_cast %18 : i32 to index
      %c0_22 = arith.constant 0 : index
      %c0_23 = arith.constant 0 : index
      %41 = vector.load %arg5[%c0_21, %40, %c0_22, %c0_23] : memref<1x15x8x32xf32, #tpu.memory_space<vmem>>, vector<1x1x8x32xf32>
      %42 = vector.shape_cast %41 : vector<1x1x8x32xf32> to vector<8x32xf32>
      %43 = vector.shape_cast %39 : vector<8x32xf32> to vector<1x1x8x32xf32>
      tpu.vector_store %arg5[%c0_21, %40, %c0_22, %c0_23], %43 {strides = array<i32>} : memref<1x15x8x32xf32, #tpu.memory_space<vmem>>, vector<1x1x8x32xf32>,
      scf.yield %39, %37 : vector<8x32xf32>, vector<8x32xf32>
    }
    %c15_i32_15 = arith.constant 15 : i32
    return
  }
  func.func @transform_0(%arg0: i32) -> (i32, i32) {
    %c0_i32 = arith.constant 0 : i32
    %c0_i32_0 = arith.constant 0 : i32
    %c0_i32_1 = arith.constant 0 : i32
    return %c0_i32, %c0_i32_0 : i32, i32
  }
  func.func @transform_1(%arg0: i32) -> (i32, i32, i32) {
    %c0_i32 = arith.constant 0 : i32
    %c0_i32_0 = arith.constant 0 : i32
    %c0_i32_1 = arith.constant 0 : i32
    return %arg0, %c0_i32, %c0_i32_0 : i32, i32, i32
  }
  func.func @transform_2(%arg0: i32) -> (i32, i32, i32) {
    %c0_i32 = arith.constant 0 : i32
    %c0_i32_0 = arith.constant 0 : i32
    %c0_i32_1 = arith.constant 0 : i32
    return %arg0, %c0_i32, %c0_i32_0 : i32, i32, i32
  }
  func.func @transform_3(%arg0: i32) -> (i32, i32, i32) {
    %c0_i32 = arith.constant 0 : i32
    %c0_i32_0 = arith.constant 0 : i32
    %c0_i32_1 = arith.constant 0 : i32
    return %arg0, %c0_i32, %c0_i32_0 : i32, i32, i32
  }
  func.func @transform_4(%arg0: i32) -> (i32, i32, i32, i32) {
    %c0_i32 = arith.constant 0 : i32
    %c0_i32_0 = arith.constant 0 : i32
    %c0_i32_1 = arith.constant 0 : i32
    %c0_i32_2 = arith.constant 0 : i32
    return %arg0, %c0_i32, %c0_i32_0, %c0_i32_1 : i32, i32, i32, i32
  }
}

</mosaic_0001>

<bundles_post_ra>
// kernel: tpu_custom_call.1
= control target key start
LH: loop header
LB: loop body
LE: loop exit
PB: predicated region body
PF: predicated region fallthrough
CT: control target
= control target key end

     0   :  { %9 = vsyncpa [#allocation4], 0  ;;  %s1150_s0 = inlined_call_operand.vmem [shape: bf16[120,32], index: 0, kind: input, shape index: {}]   ;;  %s1151_s1 = inlined_call_operand.vmem [shape: bf16[2,32,128], index: 1, kind: input, shape index: {}]   ;;  %s1152_s2 = inlined_call_operand.vmem [shape: bf16[2,32,128], index: 2, kind: input, shape index: {}]   ;;  %s1153_s3 = inlined_call_operand.vmem [shape: f32[2,1,128], index: 3, kind: input, shape index: {}]   ;;  %s1154_s4 = inlined_call_operand.hbm [shape: f32[2,15,8,32], index: 4, kind: output, shape index: {}]  }
   0x1   :  { %11 = vsyncpa [#allocation4 + $0x1], 0  ;;  %s954_s15 = smov 0   ;;  %s956_s16 = smov 0  }
   0x2   :  { %s958_s17 = smov 0   ;;  %s960_s18 = smov 0  }
   0x3 LB: > { %s975_s19 = sadd.s32 4294967295, %s908_s18   ;;  %s663_s20 = sadd.s32 4294967294, %s908_s18   ;;  %s908_s18 = sphi %s960_s18, %s1160_s18   ;;  %s904_s17 = sphi %s958_s17, %s1159_s17   ;;  %s900_s16 = sphi %s956_s16, %s1158_s16   ;;  %s896_s15 = sphi %s954_s15, %s1157_s15  }
   0x4   : > { %s979_s21 = sadd.s32 1, %s908_s18   ;;  %s123_s22 = sadd.s32 1, %s904_s17 }
   0x5   : > { %s120_s23 = ssub.s32 %s908_s18, %s979_s21  ;;  %p133_p0 = scmp.ne.s32.totalorder %s904_s17, %s900_s16 }
   0x6   : > { %p121_p1 = scmp.eq.s32.totalorder %s120_s23, 0  ;;  %p134_p2 = scmp.eq.s32.totalorder %s975_s19, 1 }
   0x7   : > { %p139_p3 = scmp.ne.s32.totalorder %s900_s16, %s896_s15  ;;  %p140_p4 = scmp.eq.s32.totalorder %s663_s20, 1 }
   0x8   : > { %s990_s24 = scalar_select %p121_p1, %s904_s17, %s123_s22  }
   0x9   : > { %p992_p5 = por %p134_p2, %p133_p0  ;;  %p996_p6 = por %p140_p4, %p139_p3 }
   0xa   : > { %p666_p7 = scmp.ge.s32.totalorder %s908_s18, 1  ;;  %p183_p8 = scmp.lt.s32.totalorder %s908_s18, 3 }
   0xc   : > { %p184_p9 = pnand %p666_p7, %p183_p8 }
   0xd   : > { %s214_s27 = sand.u32 (!%p184_p9), 1, %s900_s16   ;;  %p217_p10 = scmp.lt.s32.totalorder (!%p184_p9), %s975_s19, 1  ;;  %v818_v0 = vld [vmem:[%s1150_s0] sm:$0xff] (!%p184_p9)   ;;  %vm307_vm0 = vcmask (!%p184_p9), 261120   ;;  %v820_v8 = vld [vmem:[%s1150_s0 + $0x8] sm:$0xff] (!%p184_p9)   ;;  %v822_v10 = vld [vmem:[%s1150_s0 + $0x10] sm:$0xff] (!%p184_p9)  }
   0xe   : > { %187 = sbr.rel (%p184_p9) target bundleno = 1095 (0x447), region = 36  ;;  %v819_v1 = vld [vmem:[%s1150_s0 + $0x20] sm:$0xff] (!%p184_p9)   ;;  %717 = vmatprep.mubr.msk.bf16.mxu0 (!%p184_p9), %vm307_vm0, %v818_v0  ;;  %v821_v9 = vld [vmem:[%s1150_s0 + $0x28] sm:$0xff] (!%p184_p9)   ;;  %v823_v11 = vld [vmem:[%s1150_s0 + $0x30] sm:$0xff] (!%p184_p9)   ;;  %v1063_v46 = vmov (!%p184_p9), 0.0   ;;  %v914_v47 = vmov (!%p184_p9), 0.0  }
   0xf   : > { %s1006_s28 = smul.u32 (!%p184_p9), 120, %s214_s27  ;;  %725 = vmatprep.mubr.msk.bf16.mxu1 (!%p184_p9), %vm307_vm0, %v819_v1  ;;  %v824_v12 = vld [vmem:[%s1150_s0 + $0x18] sm:$0xff] (!%p184_p9)   ;;  %s1065_s22 = smov (!%p184_p9), 0  }
  0x10   : > { %v825_v13 = vld [vmem:[%s1150_s0 + $0x38] ss:$0 sps:$4 sm:$0xff] (!%p184_p9)  }
  0x15   : > { %s1015_s7 = scalar_select %p217_p10, %s975_s19, 1 }
  0x17   : > { %s698_s8 = sshll.u32 %s1015_s7, 4  ;;  %s229_s20 = scalar_lea.vmem %s1153_s3, %s1015_s7 }
  0x18   : > { %s221_s11 = scalar_lea.vmem %s1151_s1, %s698_s8  ;;  %s226_s14 = scalar_lea.vmem %s1152_s2, %s698_s8  ;;  %v671_v14 = vld [vmem:[%s229_s20] ss:$0 sm:$0xff] }
  0x19   : > { %v816_v2 = vld [vmem:[%s221_s11] sm:$0xff]   ;;  %v1030_v5 = vld [vmem:[%s226_s14 + $0x8] sm:$0xf]  ;;  %v1032_v6 = vld [vmem:[%s226_s14 + $0xc] sm:$0xf]  ;;  %s216_s7 = scalar_lea.vmem [#allocation3], %s1006_s28 }
  0x1a   : > { %v1026_v3 = vld [vmem:[%s226_s14] sm:$0xf]  ;;  %v1028_v4 = vld [vmem:[%s226_s14 + $0x4] sm:$0xf]  ;;  %713 = vmatprep.subr.bf16.mxu0 %v816_v2  ;;  %741 = vmatprep.subr.bf16.mxu1 %v816_v2  ;;  %v817_v7 = vld [vmem:[%s221_s11 + $0x8] sm:$0xff]  }
  0x1b   : > { %714 = vmatpush3.bf16.msra.mxu0 %v816_v2  ;;  %743 = vmatpush3.bf16.msra.mxu1 %v816_v2 }
  0x1c   : > { %715 = vmatprep.subr.bf16.mxu0 %v817_v7  ;;  %742 = vmatprep.subr.bf16.mxu1 %v817_v7 }
  0x1f   : > { %716 = vmatpush3.bf16.msra.mxu0 %v817_v7  ;;  %744 = vmatpush3.bf16.msra.mxu1 %v817_v7 }
  0x22   : > { %718 = vmatmul.mubr.msk.bf16.vlgmr.msra.gmra.mrb[0].mxu0 %vm307_vm0, %v820_v8  ;;  %726 = vmatmul.mubr.msk.bf16.vlgmr.msra.gmra.mrb[0].mxu1 %vm307_vm0, %v821_v9 }
  0x23   : > { %721 = vmatprep.mubr.msk.bf16.mxu0 %vm307_vm0, %v822_v10  ;;  %729 = vmatprep.mubr.msk.bf16.mxu1 %vm307_vm0, %v823_v11 }
  0x2a   : > { %722 = vmatmul.mubr.msk.bf16.gmra.mrb[4].mxu0 %vm307_vm0, %v824_v12  ;;  %730 = vmatmul.mubr.msk.bf16.gmra.mrb[4].mxu1 %vm307_vm0, %v825_v13 }
  0xf5   : > { %v719_v15 = vpop.f32.mrb[0].mxu0  ;;  %v727_v16 = vpop.f32.mrb[0].mxu1 }
  0xf6   : > { %v375_v17 = vadd.f32 %v719_v15, %v671_v14  ;;  %v407_v18 = vadd.f32 %v727_v16, %v671_v14  ;;  %v366_v19 = vpop.f32.mrb[1].mxu0  ;;  %v398_v20 = vpop.f32.mrb[1].mxu1 }
  0xf7   : > { %v367_v21 = vadd.f32 %v671_v14, %v366_v19  ;;  %v399_v22 = vadd.f32 %v671_v14, %v398_v20  ;;  %v720_v23 = vpop.f32.mrb[2].mxu0  ;;  %v728_v24 = vpop.f32.mrb[2].mxu1 }
  0xf8   : > { %430 = vst [vmem:[#allocation2 + $0x10] sm:$0xff] %v375_v17  ;;  %438 = vst [vmem:[#allocation2 + $0x50] sm:$0xff] %v407_v18  ;;  %v378_v25 = vadd.f32 %v720_v23, %v671_v14  ;;  %v410_v26 = vadd.f32 %v728_v24, %v671_v14  ;;  %v369_v27 = vpop.f32.mrb[3].mxu0  ;;  %v401_v28 = vpop.f32.mrb[3].mxu1 }
  0xf9   : > { %428 = vst [vmem:[#allocation2] sm:$0xff] %v367_v21  ;;  %436 = vst [vmem:[#allocation2 + $0x40] sm:$0xff] %v399_v22  ;;  %v370_v29 = vadd.f32 %v671_v14, %v369_v27  ;;  %v402_v30 = vadd.f32 %v671_v14, %v401_v28 }
  0xfa   : > { %431 = vst [vmem:[#allocation2 + $0x18] sm:$0xff] %v378_v25  ;;  %439 = vst [vmem:[#allocation2 + $0x58] sm:$0xff] %v410_v26 }
  0xfb   : > { %429 = vst [vmem:[#allocation2 + $0x8] sm:$0xff] %v370_v29  ;;  %437 = vst [vmem:[#allocation2 + $0x48] sm:$0xff] %v402_v30 }
  0xfd   : > { %v723_v31 = vpop.f32.mrb[4].mxu0  ;;  %v731_v32 = vpop.f32.mrb[4].mxu1 }
  0xfe   : > { %v391_v33 = vadd.f32 %v723_v31, %v671_v14  ;;  %v423_v34 = vadd.f32 %v731_v32, %v671_v14  ;;  %v382_v35 = vpop.f32.mrb[5].mxu0  ;;  %v414_v36 = vpop.f32.mrb[5].mxu1 }
  0xff   : > { %v383_v37 = vadd.f32 %v671_v14, %v382_v35  ;;  %v415_v38 = vadd.f32 %v671_v14, %v414_v36  ;;  %v724_v39 = vpop.f32.mrb[6].mxu0  ;;  %v732_v40 = vpop.f32.mrb[6].mxu1 }
 0x100   : > { %434 = vst [vmem:[#allocation2 + $0x30] sm:$0xff] %v391_v33  ;;  %442 = vst [vmem:[#allocation2 + $0x70] sm:$0xff] %v423_v34  ;;  %v394_v41 = vadd.f32 %v724_v39, %v671_v14  ;;  %v385_v42 = vpop.f32.mrb[7].mxu0  ;;  %v417_v43 = vpop.f32.mrb[7].mxu1 }
 0x101   : > { %432 = vst [vmem:[#allocation2 + $0x20] sm:$0xff] %v383_v37  ;;  %440 = vst [vmem:[#allocation2 + $0x60] sm:$0xff] %v415_v38  ;;  %v386_v44 = vadd.f32 %v671_v14, %v385_v42  ;;  %v418_v45 = vadd.f32 %v671_v14, %v417_v43 }
 0x102   : > { %435 = vst [vmem:[#allocation2 + $0x38] sm:$0xff] %v394_v41 }
 0x103   : > { %433 = vst [vmem:[#allocation2 + $0x28] sm:$0xff] %v386_v44  ;;  %441 = vst [vmem:[#allocation2 + $0x68] sm:$0xff] %v418_v45 }
 0x104 LB: >> { %v691_v48 = vcombine.low %v1026_v3, %v1028_v4  ;;  %v922_v49 = vmov 0.0   ;;  %v461_v50 = vpack.c.bf16 %v916_v47, %v916_v47  ;;  %v692_v51 = vcombine.low %v1030_v5, %v1032_v6  ;;  %s924_s23 = smov 32   ;;  %p455_p11 = scmp.eq.s32.totalorder %s975_s19, 0  ;;  %s920_s22 = sphi %s1065_s22, %s452_s22   ;;  %v916_v47 = vphi %v914_v47, %v544_v47   ;;  %v912_v46 = vphi %v1063_v46, %v538_v46  }
 0x105   : >> { %733 = vmatprep.subr.bf16.mxu0 %v922_v49  ;;  %vm923_vm1 = vmmov 0   ;;  %s456_s29 = ssub.s32 14, %s920_s22  ;;  %s925_s8 = smov 64  }
 0x106   : >> { %734 = vmatpush3.bf16.msra.mxu0 %v691_v48  ;;  %737 = vmatprep.mubr.msk.bf16.mxu0 %vm923_vm1, %v922_v49  ;;  %s1080_s30 = scalar_select %p455_p11, %s920_s22, %s456_s29 }
 0x107   : >> { %735 = vmatprep.subr.bf16.mxu0 %v922_v49  ;;  %463 = vrot.lane.b32.xlu0 %v461_v50, %s924_s23  ;;  %s452_s22 = sadd.s32 1, %s920_s22  }
 0x108   : >> { %s690_s5 = sshll.u32 %s1080_s30, 3  ;;  %p449_p12 = scmp.ge.s32.totalorder %s452_s22, 15  }
 0x109   : >> { %s459_s6 = scalar_lea.vmem [#allocation2], %s690_s5  ;;  %s549_s9 = scalar_lea.vmem %s216_s7, %s690_s5 [#allocation3] }
 0x10a   : >> { %736 = vmatpush3.bf16.msra.mxu0 %v692_v51  ;;  %v460_v53 = vld [vmem:[%s459_s6] sm:$0xff]  ;;  %s746_s10 = smul.u32 (%p449_p12), 1920, %s975_s19  ;;  %s565_s11 = sshll.u32 (%p449_p12), %s216_s7, 4  ;;  %s1105_s11 = int_to_ptr.vmem [resolvable:$true] %s565_s11 }
 0x10b   : > { %s1109_s20 = scalar_lea.sflag (%p449_p12), [#allocation4], %s214_s27  ;;  %s834_s22 = scalar_lea.vmem (%p449_p12), %s1105_s11, 1920 }
 0x10c   : > { %s1103_s14 = scalar_lea.hbm (%p449_p12), %s1154_s4, %s746_s10  ;;  %p835_p13 = scmp.ne.s32.totalorder (%p449_p12), %s1105_s11, %s834_s22 }
 0x10d   : > { %s926_s19 = smov (%p449_p12), [#allocation3]  }
 0x10e   : > { %p836_p0 = pnand (%p449_p12), %p835_p13, %p992_p5  ;;  %s838_s28 = sshll.u32 (%p449_p12), %s926_s19, 4  ;;  %s839_s28 = int_to_ptr.vmem [resolvable:$false] %s838_s28 }
 0x10f   : > { %s840_s7 = scalar_lea.vmem (%p449_p12), %s839_s28, 3840  ;;  %p841_p2 = scmp.lt.s32.totalorder (%p449_p12), %s1105_s11, %s839_s28 }
 0x110   : > { %p837_p1 = pneg (%p449_p12), %p836_p0  ;;  %p842_p3 = scmp.lt.s32.totalorder (%p449_p12), %s840_s7, %s834_s22 }
 0x112   : > { %p843_p4 = por (%p449_p12), %p842_p3, %p841_p2 }
 0x114   : > { %p844_p7 = pnand (%p449_p12), %p843_p4, %p837_p1 }
 0x179   : >> { %v464_v52 = vpop.permute.xlu0 %463 }
 0x17a   : >> { %738 = vmatmul.mubr.msk.bf16.vlgmr.msra.gmra.mrb[0].mxu0 %vm307_vm0, %v464_v52 }
 0x24d   : >> { %v514_v54 = vpop.f32.mrb[0].mxu0 }
 0x24e   : >> { %v520_v55 = vadd.f32 %v514_v54, %v460_v53  ;;  %v739_v56 = vpop.f32.mrb[1].mxu0 }
 0x24f   : >> { %v517_v57 = vpop.f32.mrb[2].mxu0 }
 0x250   : >> { %826 = vtanh.f32 %v520_v55  ;;  %v740_v58 = vpop.f32.mrb[3].mxu0  ;;  %v694_v60 = vmul.f32 -1.442695, %v520_v55 }
 0x252   : >> { %828 = vpow2.f32 %v694_v60 }
 0x25a   : >> { %v827_v59 = vpop.eup %826 }
 0x25b   : >> { %530 = vrot.lane.b32.xlu0 %v827_v59, %s925_s8 }
 0x25c   : >> { %v829_v61 = vpop.eup %828 }
 0x25d   : >> { %v524_v62 = vadd.f32 1.0, %v829_v61 }
 0x25f   : >> { %830 = vrcp.f32 %v524_v62 }
 0x269   : >> { %v831_v63 = vpop.eup %830 }
 0x26a   : >> { %v528_v2 = vmul.f32 %v912_v46, %v831_v63 }
 0x2cd   : >> { %v531_v0 = vpop.permute.xlu0 %530 }
 0x2ce   : >> { %v533_v1 = vmul.f32 %v831_v63, %v531_v0 }
 0x2d0   : >> { %535 = vrot.lane.b32.xlu1 %v533_v1, %s924_s23 }
 0x342   : >> { %v536_v7 = vpop.permute.xlu1 %535 }
 0x343   : >> { %v538_v46 = vadd.f32 %v536_v7, %v528_v2  }
 0x345   : >> { %832 = vtanh.f32 %v538_v46 }
 0x34f   : >> { %v833_v8 = vpop.eup %832 }
 0x350   : >> { %541 = vrot.lane.b32.xlu1 %v833_v8, %s925_s8 }
 0x3c2   : >> { %v542_v9 = vpop.permute.xlu1 %541 }
 0x3c3   : >> { %v544_v47 = vmul.f32 %v831_v63, %v542_v9  }
 0x3c5   : >> { %546 = vrot.lane.b32.xlu0 %v544_v47, %s924_s23 }
 0x432   : > { %451 = sbr.rel (!%p449_p12) target bundleno = 260 (0x104), region = 86 }
 0x437   : >> { %v547_v10 = vpop.permute.xlu0 %546 }
 0x438   : >> { %550 = vst.msk [vmem:[%s549_s9] sm:$0xff] %vm307_vm0, %v547_v10 }
 0x439   : > { %847 = shalt.err (!%p844_p7)
}
 0x43a   : > { %s848_s27 = scalar_lea.hbm %s1103_s14, 1920  ;;  %s852_s30 = scalar_lea.hbm %s1154_s4, 3840 }
 0x43b   : > { %p849_p8 = scmp.ne.s32.totalorder %s1103_s14, %s848_s27  ;;  %p853_p11 = scmp.lt.u32.totalorder %s1103_s14, %s1154_s4 }
 0x43c   : > { %p854_p12 = scmp.lt.u32.totalorder %s852_s30, %s848_s27  ;;  %p856_p0 = scmp.lt.u32.totalorder %s848_s27, %s1103_s14 }
 0x43d   : > { %p850_p9 = pnand %p849_p8, %p992_p5 }
 0x43e   : > { %p855_p13 = por %p854_p12, %p853_p11 }
 0x43f   : > { %p851_p10 = pneg %p850_p9 }
 0x440   : > { %p857_p1 = por %p856_p0, %p855_p13 }
 0x442   : > { %p858_p2 = pnand %p857_p1, %p851_p10 }
 0x444   : > { %861 = shalt.err (!%p858_p2)
}
 0x445   : > { %s927_s8 = smov 128   ;;  %s928_s9 = smov 8  }
 0x446   : > { %747 = dma.vmem_to_hbm [thread:$0]  (%p992_p5), %s1105_s11, 1920, %s1103_s14, %s1109_s20, %s927_s8, %s927_s8, %s928_s9  }
 0x447 PF: > { %p753_p3 = scmp.ge.s32.totalorder %s908_s18, 2  ;;  %s580_s10 = sand.u32 1, %s896_s15  }
 0x448   : > { %s581_s12 = scalar_lea.sflag [#allocation4], %s580_s10 }
 0x449   : > { %p750_p4 = pnand %p753_p3, %p996_p6 }
 0x44b   : > { %891 = dma.done.wait (!%p750_p4), %s581_s12, 1920  }
 0x44c   : > { %893 = vsyncadd (!%p750_p4), %s581_s12, 4294965376  ;;  %p14_p7 = scmp.ge.s32.totalorder %s979_s21, 4   ;;  %s1157_s15 = smov %s900_s16 }
 0x44d   : > { %s1158_s16 = smov %s904_s17  ;;  %s1159_s17 = smov %s990_s24 }
 0x44e   : > { %s1160_s18 = smov %s979_s21  ;;  %16 = sbr.rel (!%p14_p7) target bundleno = 3 (0x3), region = 97 }
 0x455   :  { %586 = vsyncpa [#allocation4], 1 }
 0x456   :  { %588 = vsyncpa [#allocation4 + $0x1], 1 }

</bundles_post_ra>
